<compile_context>
chip_gen: v7x
topology: tpu7x:2x2x1
jax: 0.10.0
libtpu: 0.0.40
codegen_flags: <defaults>
</compile_context>

<pallas_src>
import jax
import jax.numpy as jnp
from jax.experimental import pallas as pl
from jax.experimental.pallas import tpu as pltpu


# ----------------------------------------------------------------------------
# Fused Pallas kernel: whole BottleneckLayer, whole batch, single invocation
# ----------------------------------------------------------------------------
def _bottleneck_kernel(x_ref, w1_ref, b1_ref, w2_ref, b2_ref, o_ref):
    # x_ref : (B, C_in, L)            f32  input (PyTorch NCL layout)
    # w1_ref: (C_mid, C_in)           f32  BN1-folded 1x1 conv weight
    # b1_ref: (C_mid, 1)              f32  BN1-folded bias
    # w2_ref: (C_out, 3 * C_mid)      f32  BN2-folded k=3 conv weight, taps flattened [l-1, l, l+1]
    # b2_ref: (C_out, 1)              f32  BN2-folded bias
    # o_ref : (B, C_in + C_out, L)    f32  output = cat((x, out), channel axis)
    B, C_in, L = x_ref.shape
    BL = B * L

    # Fold the batch into the lane axis: (C_in, B*L). Lane concat of 128-wide tiles is cheap.
    x2 = jnp.concatenate([x_ref[i] for i in range(B)], axis=1)

    # conv1 (1x1) + BN1 + ReLU on the VPU: K=C_in=4 is far too small to feed the MXU, so do
    # C_in unrolled broadcast multiply-accumulates instead (frees the MXU, avoids fill/drain).
    w1 = w1_ref[...]
    h = b1_ref[...] + sum(w1[:, i:i + 1] * x2[i:i + 1, :] for i in range(C_in))
    h = jnp.maximum(h, 0.0)                                         # (C_mid, B*L) f32

    # TODO(synk): nn.Dropout(p=0.1) is an inference-mode no-op here (no training RNG masking).

    # Per-batch zero-padding masks for the k=3 taps, built on ONE (1, B*L) iota vreg.
    col = jax.lax.broadcasted_iota(jnp.int32, (1, BL), 1)
    prev_zero = col == 0
    next_zero = col == L - 1
    for i in range(1, B):
        prev_zero = jnp.logical_or(prev_zero, col == i * L)
        next_zero = jnp.logical_or(next_zero, col == i * L + L - 1)
    mask_prev = jnp.where(prev_zero, 0.0, 1.0).astype(h.dtype)      # (1, B*L)
    mask_next = jnp.where(next_zero, 0.0, 1.0).astype(h.dtype)      # (1, B*L)

    # conv2 (k=3, pad=1) + BN2 + ReLU as ONE MXU matmul over an im2col block:
    #   out[l] = W0 . h[l-1] + W1 . h[l] + W2 . h[l+1], h[-1] = h[L] = 0 per batch element.
    h_prev = pltpu.roll(h, shift=1, axis=1) * mask_prev             # h[l-1]
    h_next = pltpu.roll(h, shift=BL - 1, axis=1) * mask_next        # h[l+1]
    hcat = jnp.concatenate([h_prev, h, h_next], axis=0)             # (3*C_mid, B*L)
    out = jnp.dot(w2_ref[...], hcat, preferred_element_type=jnp.float32)   # (C_out, B*L)
    out = jnp.maximum(out + b2_ref[...], 0.0)

    # torch.cat((x, out), dim=1): direct per-batch stores, no extra sublane-concat relayout.
    for i in range(B):
        o_ref[i, :C_in, :] = x_ref[i]
        o_ref[i, C_in:, :] = out[:, i * L:(i + 1) * L]


def bottleneck_layer_forward(x, params):
    """Fused BottleneckLayer forward. x: (B, C_in, L) f32 -> (B, C_in + C_out, L) f32."""
    B, C_in, L = x.shape
    w1, b1, w2, b2 = params["w1"], params["b1"], params["w2"], params["b2"]
    C_out = w2.shape[0]
    vmem = pl.BlockSpec(memory_space=pltpu.MemorySpace.VMEM)
    return pl.pallas_call(
        _bottleneck_kernel,
        out_shape=jax.ShapeDtypeStruct((B, C_in + C_out, L), jnp.float32),
        in_specs=[vmem, vmem, vmem, vmem, vmem],
        out_specs=vmem,
    )(x, w1, b1, w2, b2)


# ----------------------------------------------------------------------------
# Deterministic parameter construction (shapes per the module __init__)
# ----------------------------------------------------------------------------
def make_raw_params(key, c_in, c_out):
    """Raw PyTorch-shaped params: conv weights (C_out, C_in, K), BN (gamma, beta, mean, var)."""
    c_mid = 4 * c_out
    ks = jax.random.split(key, 10)
    w1 = jax.random.normal(ks[0], (c_mid, c_in, 1), jnp.float32) / jnp.sqrt(float(c_in))
    g1 = jax.random.uniform(ks[1], (c_mid,), jnp.float32, 0.5, 1.5)
    be1 = jax.random.normal(ks[2], (c_mid,), jnp.float32) * 0.1
    m1 = jax.random.normal(ks[3], (c_mid,), jnp.float32) * 0.1
    v1 = jax.random.uniform(ks[4], (c_mid,), jnp.float32, 0.5, 1.5)
    w2 = jax.random.normal(ks[5], (c_out, c_mid, 3), jnp.float32) / jnp.sqrt(float(3 * c_mid))
    g2 = jax.random.uniform(ks[6], (c_out,), jnp.float32, 0.5, 1.5)
    be2 = jax.random.normal(ks[7], (c_out,), jnp.float32) * 0.1
    m2 = jax.random.normal(ks[8], (c_out,), jnp.float32) * 0.1
    v2 = jax.random.uniform(ks[9], (c_out,), jnp.float32, 0.5, 1.5)
    return {"w1": w1, "bn1": (g1, be1, m1, v1), "w2": w2, "bn2": (g2, be2, m2, v2)}


def fold_params(raw, eps=1e-5):
    """Fold inference BatchNorm into the (bias-free) convs; flatten conv2 taps. All f32."""
    g1, be1, m1, v1 = raw["bn1"]
    s1 = g1 / jnp.sqrt(v1 + eps)
    b1 = be1 - m1 * s1
    w1 = (raw["w1"][:, :, 0] * s1[:, None]).astype(jnp.float32)        # (C_mid, C_in)

    g2, be2, m2, v2 = raw["bn2"]
    s2 = g2 / jnp.sqrt(v2 + eps)
    b2 = be2 - m2 * s2
    w2f = raw["w2"] * s2[:, None, None]                                 # (C_out, C_mid, 3)
    w2 = jnp.concatenate([w2f[:, :, 0], w2f[:, :, 1], w2f[:, :, 2]],
                         axis=1).astype(jnp.float32)                    # (C_out, 3*C_mid)
    return {"w1": w1, "b1": b1.reshape(-1, 1).astype(jnp.float32),
            "w2": w2, "b2": b2.reshape(-1, 1).astype(jnp.float32)}


# ----------------------------------------------------------------------------
# Pure-JAX f32 reference (PyTorch inference semantics) for a sanity check
# ----------------------------------------------------------------------------
def reference_forward(x, raw, eps=1e-5):
    hp_prec = jax.lax.Precision.HIGHEST

    def bn(y, stats):
        g, b, m, v = stats
        s = g / jnp.sqrt(v + eps)
        return (y - m[None, :, None]) * s[None, :, None] + b[None, :, None]

    L = x.shape[-1]
    h = jnp.einsum("oi,bil->bol", raw["w1"][:, :, 0], x, precision=hp_prec)
    h = jnp.maximum(bn(h, raw["bn1"]), 0.0)
    hpad = jnp.pad(h, ((0, 0), (0, 0), (1, 1)))
    out = sum(jnp.einsum("oc,bcl->bol", raw["w2"][:, :, k], hpad[:, :, k:k + L],
                         precision=hp_prec)
              for k in range(3))
    out = jnp.maximum(bn(out, raw["bn2"]), 0.0)
    return jnp.concatenate([x, out], axis=1)


if __name__ == "__main__":
    B, C_IN, C_OUT, L = 2, 4, 16, 128

    key = jax.random.PRNGKey(0)
    kx, kp = jax.random.split(key)
    x = jax.random.normal(kx, (B, C_IN, L), jnp.float32)

    raw = make_raw_params(kp, C_IN, C_OUT)
    params = fold_params(raw)

    fwd = jax.jit(bottleneck_layer_forward)
    out = jax.block_until_ready(fwd(x, params))

    assert out.shape == (B, C_IN + C_OUT, L), out.shape
    assert out.dtype == jnp.float32

    ref = reference_forward(x, raw)
    max_err = float(jnp.max(jnp.abs(out - ref)))
    assert jnp.allclose(out, ref, rtol=5e-2, atol=5e-2), f"max abs err {max_err}"

    print("KERNEL_OK")
</pallas_src>

<mosaic_0001>
module attributes {stable_mosaic.version = 11 : i64} {
  func.func @_bottleneck_kernel(%arg0: memref<2x4x128xf32, #tpu.memory_space<vmem>>, %arg1: memref<64x4xf32, #tpu.memory_space<vmem>>, %arg2: memref<64x1xf32, #tpu.memory_space<vmem>>, %arg3: memref<16x192xf32, #tpu.memory_space<vmem>>, %arg4: memref<16x1xf32, #tpu.memory_space<vmem>>, %arg5: memref<2x20x128xf32, #tpu.memory_space<vmem>>) attributes {dimension_semantics = [], scalar_prefetch = 0 : i64, scratch_operands = 0 : i64, tpu.core_type = #tpu.core_type<tc>} {
    %c0 = arith.constant 0 : index
    %c0_0 = arith.constant 0 : index
    %c0_1 = arith.constant 0 : index
    %0 = vector.load %arg0[%c0, %c0_0, %c0_1] : memref<2x4x128xf32, #tpu.memory_space<vmem>>, vector<1x4x128xf32>
    %1 = vector.shape_cast %0 : vector<1x4x128xf32> to vector<4x128xf32>
    %c1 = arith.constant 1 : index
    %c0_2 = arith.constant 0 : index
    %c0_3 = arith.constant 0 : index
    %2 = vector.load %arg0[%c1, %c0_2, %c0_3] : memref<2x4x128xf32, #tpu.memory_space<vmem>>, vector<1x4x128xf32>
    %3 = vector.shape_cast %2 : vector<1x4x128xf32> to vector<4x128xf32>
    %4 = tpu.concatenate %1, %3 in 1 : vector<4x128xf32>, vector<4x128xf32> -> vector<4x256xf32>
    %c0_4 = arith.constant 0 : index
    %c0_5 = arith.constant 0 : index
    %5 = vector.load %arg1[%c0_4, %c0_5] : memref<64x4xf32, #tpu.memory_space<vmem>>, vector<64x4xf32>
    %c0_6 = arith.constant 0 : index
    %c0_7 = arith.constant 0 : index
    %6 = vector.load %arg2[%c0_6, %c0_7] : memref<64x1xf32, #tpu.memory_space<vmem>>, vector<64x1xf32>
    %7 = vector.extract_strided_slice %5 {offsets = [0, 0], sizes = [64, 1], strides = [1, 1]} : vector<64x4xf32> to vector<64x1xf32>
    %8 = vector.extract_strided_slice %4 {offsets = [0, 0], sizes = [1, 256], strides = [1, 1]} : vector<4x256xf32> to vector<1x256xf32>
    %9 = vector.broadcast %7 : vector<64x1xf32> to vector<64x256xf32>
    %10 = vector.broadcast %8 : vector<1x256xf32> to vector<64x256xf32>
    %11 = arith.mulf %9, %10 : vector<64x256xf32>
    %cst = arith.constant 0.000000e+00 : f32
    %12 = vector.broadcast %cst : f32 to vector<64x256xf32>
    %13 = arith.addf %12, %11 : vector<64x256xf32>
    %14 = vector.extract_strided_slice %5 {offsets = [0, 1], sizes = [64, 1], strides = [1, 1]} : vector<64x4xf32> to vector<64x1xf32>
    %15 = vector.extract_strided_slice %4 {offsets = [1, 0], sizes = [1, 256], strides = [1, 1]} : vector<4x256xf32> to vector<1x256xf32>
    %16 = vector.broadcast %14 : vector<64x1xf32> to vector<64x256xf32>
    %17 = vector.broadcast %15 : vector<1x256xf32> to vector<64x256xf32>
    %18 = arith.mulf %16, %17 : vector<64x256xf32>
    %19 = arith.addf %13, %18 : vector<64x256xf32>
    %20 = vector.extract_strided_slice %5 {offsets = [0, 2], sizes = [64, 1], strides = [1, 1]} : vector<64x4xf32> to vector<64x1xf32>
    %21 = vector.extract_strided_slice %4 {offsets = [2, 0], sizes = [1, 256], strides = [1, 1]} : vector<4x256xf32> to vector<1x256xf32>
    %22 = vector.broadcast %20 : vector<64x1xf32> to vector<64x256xf32>
    %23 = vector.broadcast %21 : vector<1x256xf32> to vector<64x256xf32>
    %24 = arith.mulf %22, %23 : vector<64x256xf32>
    %25 = arith.addf %19, %24 : vector<64x256xf32>
    %26 = vector.extract_strided_slice %5 {offsets = [0, 3], sizes = [64, 1], strides = [1, 1]} : vector<64x4xf32> to vector<64x1xf32>
    %27 = vector.extract_strided_slice %4 {offsets = [3, 0], sizes = [1, 256], strides = [1, 1]} : vector<4x256xf32> to vector<1x256xf32>
    %28 = vector.broadcast %26 : vector<64x1xf32> to vector<64x256xf32>
    %29 = vector.broadcast %27 : vector<1x256xf32> to vector<64x256xf32>
    %30 = arith.mulf %28, %29 : vector<64x256xf32>
    %31 = arith.addf %25, %30 : vector<64x256xf32>
    %32 = vector.broadcast %6 : vector<64x1xf32> to vector<64x256xf32>
    %33 = arith.addf %32, %31 : vector<64x256xf32>
    %cst_8 = arith.constant 0.000000e+00 : f32
    %34 = vector.broadcast %cst_8 : f32 to vector<64x256xf32>
    %35 = arith.maximumf %33, %34 : vector<64x256xf32>
    %36 = tpu.iota {dimensions = array<i32: 1>} : vector<1x256xi32>
    %c0_i32 = arith.constant 0 : i32
    %37 = vector.broadcast %c0_i32 : i32 to vector<1x256xi32>
    %38 = arith.cmpi eq, %36, %37 : vector<1x256xi32>
    %c127_i32 = arith.constant 127 : i32
    %39 = vector.broadcast %c127_i32 : i32 to vector<1x256xi32>
    %40 = arith.cmpi eq, %36, %39 : vector<1x256xi32>
    %c128_i32 = arith.constant 128 : i32
    %41 = vector.broadcast %c128_i32 : i32 to vector<1x256xi32>
    %42 = arith.cmpi eq, %36, %41 : vector<1x256xi32>
    %43 = arith.ori %38, %42 : vector<1x256xi1>
    %c255_i32 = arith.constant 255 : i32
    %44 = vector.broadcast %c255_i32 : i32 to vector<1x256xi32>
    %45 = arith.cmpi eq, %36, %44 : vector<1x256xi32>
    %46 = arith.ori %40, %45 : vector<1x256xi1>
    %cst_9 = arith.constant 0.000000e+00 : f32
    %cst_10 = arith.constant 1.000000e+00 : f32
    %47 = vector.broadcast %cst_9 : f32 to vector<1x256xf32>
    %48 = vector.broadcast %cst_10 : f32 to vector<1x256xf32>
    %49 = arith.select %43, %47, %48 : vector<1x256xi1>, vector<1x256xf32>
    %cst_11 = arith.constant 0.000000e+00 : f32
    %cst_12 = arith.constant 1.000000e+00 : f32
    %50 = vector.broadcast %cst_11 : f32 to vector<1x256xf32>
    %51 = vector.broadcast %cst_12 : f32 to vector<1x256xf32>
    %52 = arith.select %46, %50, %51 : vector<1x256xi1>, vector<1x256xf32>
    %c1_i32 = arith.constant 1 : i32
    %53 = tpu.dynamic_rotate %35 by %c1_i32 dim 1 : vector<64x256xf32>, i32 -> vector<64x256xf32>
    %54 = vector.broadcast %49 : vector<1x256xf32> to vector<64x256xf32>
    %55 = arith.mulf %53, %54 : vector<64x256xf32>
    %c255_i32_13 = arith.constant 255 : i32
    %56 = tpu.dynamic_rotate %35 by %c255_i32_13 dim 1 : vector<64x256xf32>, i32 -> vector<64x256xf32>
    %57 = vector.broadcast %52 : vector<1x256xf32> to vector<64x256xf32>
    %58 = arith.mulf %56, %57 : vector<64x256xf32>
    %59 = tpu.concatenate %55, %35, %58 in 0 : vector<64x256xf32>, vector<64x256xf32>, vector<64x256xf32> -> vector<192x256xf32>
    %c0_14 = arith.constant 0 : index
    %c0_15 = arith.constant 0 : index
    %60 = vector.load %arg3[%c0_14, %c0_15] : memref<16x192xf32, #tpu.memory_space<vmem>>, vector<16x192xf32>
    %cst_16 = arith.constant dense<0.000000e+00> : vector<16x256xf32>
    %61 = tpu.matmul %60, %59, %cst_16 {dimension_numbers = #tpu.dot_dimension_numbers<[1], [0], [0], [1], [0, 0, 1, 1], [], []>} : vector<16x192xf32>, vector<192x256xf32>, vector<16x256xf32> -> vector<16x256xf32>
    %c0_17 = arith.constant 0 : index
    %c0_18 = arith.constant 0 : index
    %62 = vector.load %arg4[%c0_17, %c0_18] : memref<16x1xf32, #tpu.memory_space<vmem>>, vector<16x1xf32>
    %63 = vector.broadcast %62 : vector<16x1xf32> to vector<16x256xf32>
    %64 = arith.addf %61, %63 : vector<16x256xf32>
    %cst_19 = arith.constant 0.000000e+00 : f32
    %65 = vector.broadcast %cst_19 : f32 to vector<16x256xf32>
    %66 = arith.maximumf %64, %65 : vector<16x256xf32>
    %c0_20 = arith.constant 0 : index
    %c0_21 = arith.constant 0 : index
    %c0_22 = arith.constant 0 : index
    %67 = vector.load %arg0[%c0_20, %c0_21, %c0_22] : memref<2x4x128xf32, #tpu.memory_space<vmem>>, vector<1x4x128xf32>
    %68 = vector.shape_cast %67 : vector<1x4x128xf32> to vector<4x128xf32>
    %c0_23 = arith.constant 0 : index
    %c0_24 = arith.constant 0 : index
    %c0_25 = arith.constant 0 : index
    %69 = vector.load %arg5[%c0_23, %c0_24, %c0_25] : memref<2x20x128xf32, #tpu.memory_space<vmem>>, vector<1x4x128xf32>
    %70 = vector.shape_cast %69 : vector<1x4x128xf32> to vector<4x128xf32>
    %71 = vector.shape_cast %68 : vector<4x128xf32> to vector<1x4x128xf32>
    tpu.vector_store %arg5[%c0_23, %c0_24, %c0_25], %71 {strides = array<i32>} : memref<2x20x128xf32, #tpu.memory_space<vmem>>, vector<1x4x128xf32>,
    %72 = vector.extract_strided_slice %66 {offsets = [0, 0], sizes = [16, 128], strides = [1, 1]} : vector<16x256xf32> to vector<16x128xf32>
    %c0_26 = arith.constant 0 : index
    %c4 = arith.constant 4 : index
    %c0_27 = arith.constant 0 : index
    %73 = vector.load %arg5[%c0_26, %c4, %c0_27] : memref<2x20x128xf32, #tpu.memory_space<vmem>>, vector<1x16x128xf32>
    %74 = vector.shape_cast %73 : vector<1x16x128xf32> to vector<16x128xf32>
    %75 = vector.shape_cast %72 : vector<16x128xf32> to vector<1x16x128xf32>
    tpu.vector_store %arg5[%c0_26, %c4, %c0_27], %75 {strides = array<i32>} : memref<2x20x128xf32, #tpu.memory_space<vmem>>, vector<1x16x128xf32>,
    %c1_28 = arith.constant 1 : index
    %c0_29 = arith.constant 0 : index
    %c0_30 = arith.constant 0 : index
    %76 = vector.load %arg0[%c1_28, %c0_29, %c0_30] : memref<2x4x128xf32, #tpu.memory_space<vmem>>, vector<1x4x128xf32>
    %77 = vector.shape_cast %76 : vector<1x4x128xf32> to vector<4x128xf32>
    %c1_31 = arith.constant 1 : index
    %c0_32 = arith.constant 0 : index
    %c0_33 = arith.constant 0 : index
    %78 = vector.load %arg5[%c1_31, %c0_32, %c0_33] : memref<2x20x128xf32, #tpu.memory_space<vmem>>, vector<1x4x128xf32>
    %79 = vector.shape_cast %78 : vector<1x4x128xf32> to vector<4x128xf32>
    %80 = vector.shape_cast %77 : vector<4x128xf32> to vector<1x4x128xf32>
    tpu.vector_store %arg5[%c1_31, %c0_32, %c0_33], %80 {strides = array<i32>} : memref<2x20x128xf32, #tpu.memory_space<vmem>>, vector<1x4x128xf32>,
    %81 = vector.extract_strided_slice %66 {offsets = [0, 128], sizes = [16, 128], strides = [1, 1]} : vector<16x256xf32> to vector<16x128xf32>
    %c1_34 = arith.constant 1 : index
    %c4_35 = arith.constant 4 : index
    %c0_36 = arith.constant 0 : index
    %82 = vector.load %arg5[%c1_34, %c4_35, %c0_36] : memref<2x20x128xf32, #tpu.memory_space<vmem>>, vector<1x16x128xf32>
    %83 = vector.shape_cast %82 : vector<1x16x128xf32> to vector<16x128xf32>
    %84 = vector.shape_cast %81 : vector<16x128xf32> to vector<1x16x128xf32>
    tpu.vector_store %arg5[%c1_34, %c4_35, %c0_36], %84 {strides = array<i32>} : memref<2x20x128xf32, #tpu.memory_space<vmem>>, vector<1x16x128xf32>,
    return
  }
}

</mosaic_0001>

<bundles_post_ra>
// kernel: bottleneck_layer_forward.1
= control target key start
LH: loop header
LB: loop body
LE: loop exit
PB: predicated region body
PF: predicated region fallthrough
CT: control target
= control target key end

     0   :  { %v780_v0 = vmov 1   ;;  %v781_v4 = vmov 2   ;;  %v782_v7 = vmov 0   ;;  %v783_v8 = vmov 3   ;;  %s784_s27 = smov 1   ;;  %s785_s28 = smov 127   ;;  %s1260_s1 = inlined_call_operand.vmem [shape: f32[64,4], index: 1, kind: input, shape index: {}]   ;;  %s1261_s2 = inlined_call_operand.vmem [shape: f32[64,1], index: 2, kind: input, shape index: {}]   ;;  %s1262_s0 = inlined_call_operand.vmem [shape: f32[2,4,128], index: 0, kind: input, shape index: {}]   ;;  %s1263_s3 = inlined_call_operand.vmem [shape: f32[16,192], index: 3, kind: input, shape index: {}]   ;;  %s1264_s4 = inlined_call_operand.vmem [shape: f32[16,1], index: 4, kind: input, shape index: {}]   ;;  %s1265_s5 = inlined_call_operand.vmem [shape: f32[2,20,128], index: 5, kind: output, shape index: {}]  }
   0x1   :  { %765 = vset.pattern.permute.xlu0 %v780_v0  ;;  %758 = vset.pattern.permute.xlu1 %v780_v0  ;;  %v27_v1 = vld [vmem:[%s1260_s1 + $0x20] sm:$0xff]  ;;  %v24_v3 = vld [vmem:[%s1260_s1 + $0x8] sm:$0xff]  ;;  %v26_v5 = vld [vmem:[%s1260_s1 + $0x18] sm:$0xff]  ;;  %v79_v31 = vlaneseq  ;;  %vm572_vm0 = vcmask 523264  }
   0x2   :  { %v23_v2 = vld [vmem:[%s1260_s1] sm:$0xff]  ;;  %136 = vperm.xlu0 %765, %v27_v1   ;;  %v25_v6 = vld [vmem:[%s1260_s1 + $0x10] sm:$0xff]  ;;  %v28_v10 = vld [vmem:[%s1260_s1 + $0x28] sm:$0xff] }
   0x3   :  { %120 = vperm.xlu1 %758, %v23_v2   ;;  %v29_v9 = vld [vmem:[%s1260_s1 + $0x30] sm:$0xff]  ;;  %v30_v11 = vld [vmem:[%s1260_s1 + $0x38] sm:$0xff]  ;;  %v36_v13 = vld [vmem:[%s1261_s2 + $0x28] sm:$0xff]  ;;  %v80_v34 = vshrl.u32 %v79_v31, 7 }
   0x4   :  { %v34_v12 = vld [vmem:[%s1261_s2 + $0x18] sm:$0xff]  ;;  %v31_v14 = vld [vmem:[%s1261_s2] sm:$0xff]  ;;  %v32_v15 = vld [vmem:[%s1261_s2 + $0x8] sm:$0xff] }
   0x5   :  { %v33_v16 = vld [vmem:[%s1261_s2 + $0x10] sm:$0xff]  ;;  %v35_v17 = vld [vmem:[%s1261_s2 + $0x20] sm:$0xff]  ;;  %v38_v19 = vld [vmem:[%s1261_s2 + $0x38] sm:$0xff]  ;;  %v153_v36 = vsub.s32 1, %v80_v34  ;;  %v225_v40 = vsub.s32 2, %v80_v34  ;;  %v81_v41 = vsub.s32 0, %v80_v34 }
   0x6   :  { %766 = vset.pattern.permute.xlu0 %v781_v4  ;;  %v37_v18 = vld [vmem:[%s1261_s2 + $0x30] sm:$0xff]  ;;  %v887_v38 = vld [vmem:[%s1262_s0] sm:$0xf]  ;;  %v672_v39 = vld [vmem:[%s1262_s0 + $0x4] sm:$0xf]  ;;  %v297_v43 = vsub.s32 3, %v80_v34 }
   0x7   :  { %124 = vperm.xlu1 %758, %v24_v3   ;;  %192 = vperm.xlu0 %766, %v23_v2   ;;  %v895_v44 = vrot.slane %v887_v38, %v153_v36  ;;  %v897_v45 = vrot.slane %v672_v39, %v153_v36  ;;  %v900_v46 = vrot.slane %v887_v38, %v225_v40 }
   0x8   :  { %v902_v47 = vrot.slane %v672_v39, %v225_v40  ;;  %v907_v50 = vrot.slane %v887_v38, %v81_v41  ;;  %v909_v51 = vrot.slane %v672_v39, %v81_v41  ;;  %v912_v53 = vrot.slane %v887_v38, %v297_v43  ;;  %660 = vst [vmem:[%s1265_s5] sm:$0xf] %v887_v38 }
   0x9   :  { %v914_v54 = vrot.slane %v672_v39, %v297_v43 }
   0xb   :  { %759 = vset.pattern.permute.xlu1 %v781_v4  ;;  %204 = vperm.xlu0 %766, %v26_v5  }
   0xc   :  { %196 = vperm.xlu1 %759, %v24_v3  }
   0xf   :  { %208 = vperm.xlu0 %766, %v27_v1  }
  0x10   :  { %760 = vset.pattern.permute.xlu1 %v782_v7 }
  0x11   :  { %51 = vperm.xlu1 %760, %v25_v6  }
  0x13   :  { %770 = vset.pattern.permute.xlu0 %v783_v8 }
  0x14   :  { %264 = vperm.xlu0 %770, %v23_v2  }
  0x15   :  { %761 = vset.pattern.permute.xlu1 %v780_v0 }
  0x16   :  { %128 = vperm.xlu1 %761, %v25_v6  }
  0x18   :  { %276 = vperm.xlu0 %770, %v26_v5  }
  0x1a   :  { %132 = vperm.xlu1 %761, %v26_v5  }
  0x1c   :  { %280 = vperm.xlu0 %770, %v27_v1  }
  0x1e   :  { %762 = vset.pattern.permute.xlu1 %v783_v8 }
  0x1f   :  { %268 = vperm.xlu1 %762, %v24_v3  }
  0x20   :  { %288 = vperm.xlu0 %770, %v29_v9  }
  0x23   :  { %763 = vset.pattern.permute.xlu1 %v781_v4 }
  0x24   :  { %200 = vperm.xlu1 %763, %v25_v6   ;;  %777 = vset.pattern.permute.xlu0 %v782_v7 }
  0x25   :  { %41 = vperm.xlu0 %777, %v23_v2  }
  0x28   :  { %764 = vset.pattern.permute.xlu1 %v782_v7 }
  0x29   :  { %61 = vperm.xlu1 %764, %v27_v1   ;;  %46 = vperm.xlu0 %777, %v24_v3  }
  0x2d   :  { %66 = vperm.xlu1 %764, %v28_v10   ;;  %56 = vperm.xlu0 %777, %v26_v5  }
  0x31   :  { %767 = vset.pattern.permute.xlu1 %v780_v0  ;;  %76 = vperm.xlu0 %777, %v30_v11  }
  0x32   :  { %140 = vperm.xlu1 %767, %v28_v10  }
  0x35   :  { %352 = vperm.xlu0 %777, %v34_v12  }
  0x36   :  { %768 = vset.pattern.permute.xlu1 %v783_v8 }
  0x37   :  { %272 = vperm.xlu1 %768, %v25_v6  }
  0x39   :  { %362 = vperm.xlu0 %777, %v36_v13  }
  0x3b   :  { %769 = vset.pattern.permute.xlu1 %v782_v7 }
  0x3c   :  { %337 = vperm.xlu1 %769, %v31_v14  }
  0x40   :  { %342 = vperm.xlu1 %769, %v32_v15  }
  0x44   :  { %771 = vset.pattern.permute.xlu1 %v781_v4 }
  0x45   :  { %212 = vperm.xlu1 %771, %v28_v10  }
  0x49   :  { %772 = vset.pattern.permute.xlu1 %v782_v7 }
  0x4a   :  { %71 = vperm.xlu1 %772, %v29_v9  }
  0x4e   :  { %773 = vset.pattern.permute.xlu1 %v780_v0 }
  0x4f   :  { %144 = vperm.xlu1 %773, %v29_v9  }
  0x53   :  { %148 = vperm.xlu1 %773, %v30_v11  }
  0x57   :  { %774 = vset.pattern.permute.xlu1 %v783_v8 }
  0x58   :  { %284 = vperm.xlu1 %774, %v28_v10  }
  0x5c   :  { %775 = vset.pattern.permute.xlu1 %v782_v7 }
  0x5d   :  { %347 = vperm.xlu1 %775, %v33_v16  }
  0x61   :  { %776 = vset.pattern.permute.xlu1 %v781_v4 }
  0x62   :  { %216 = vperm.xlu1 %776, %v29_v9  }
  0x66   :  { %220 = vperm.xlu1 %776, %v30_v11  }
  0x6a   :  { %778 = vset.pattern.permute.xlu1 %v783_v8 }
  0x6b   :  { %292 = vperm.xlu1 %778, %v30_v11  }
  0x6f   :  { %779 = vset.pattern.permute.xlu1 %v782_v7 }
  0x70   :  { %357 = vperm.xlu1 %779, %v35_v17  }
  0x74   :  { %367 = vperm.xlu1 %779, %v37_v18  }
  0x78   :  { %372 = vperm.xlu1 %779, %v38_v19  }
  0x81   :  { %v137_v21 = vpop.permute.xlu0 %136 }
  0x82   :  { %v121_v20 = vpop.permute.xlu1 %120  ;;  %v167_v48 = vmul.f32 %v895_v44, %v137_v21  ;;  %v168_v49 = vmul.f32 %v897_v45, %v137_v21 }
  0x83   :  { %v159_v7 = vmul.f32 %v895_v44, %v121_v20  ;;  %v160_v10 = vmul.f32 %v897_v45, %v121_v20 }
  0x86   :  { %v125_v22 = vpop.permute.xlu1 %124  ;;  %v193_v23 = vpop.permute.xlu0 %192 }
  0x87   :  { %v231_v11 = vmul.f32 %v900_v46, %v193_v23  ;;  %v161_v15 = vmul.f32 %v895_v44, %v125_v22  ;;  %v232_v16 = vmul.f32 %v902_v47, %v193_v23  ;;  %v162_v19 = vmul.f32 %v897_v45, %v125_v22 }
  0x8a   :  { %v867_v25 = vpop.permute.xlu0 %204 }
  0x8b   :  { %v865_v24 = vpop.permute.xlu1 %196 }
  0x8c   :  { %v233_v36 = vmul.f32 %v900_v46, %v865_v24  ;;  %v234_v41 = vmul.f32 %v902_v47, %v865_v24  ;;  %v238_v24 = vmul.f32 %v902_v47, %v867_v25 }
  0x8e   :  { %v209_v26 = vpop.permute.xlu0 %208 }
  0x8f   :  { %v239_v56 = vmul.f32 %v900_v46, %v209_v26  ;;  %v240_v57 = vmul.f32 %v902_v47, %v209_v26 }
  0x90   :  { %v869_v27 = vpop.permute.xlu1 %51 }
  0x93   :  { %v871_v28 = vpop.permute.xlu0 %264 }
  0x94   :  { %v303_v21 = vmul.f32 %v912_v53, %v871_v28  ;;  %v304_v23 = vmul.f32 %v914_v54, %v871_v28 }
  0x95   :  { %v873_v29 = vpop.permute.xlu1 %128 }
  0x97   :  { %v875_v30 = vpop.permute.xlu0 %276 }
  0x99   :  { %v877_v32 = vpop.permute.xlu1 %132 }
  0x9a   :  { %v165_v39 = vmul.f32 %v895_v44, %v877_v32 }
  0x9b   :  { %v281_v33 = vpop.permute.xlu0 %280 }
  0x9c   :  { %v311_v60 = vmul.f32 %v912_v53, %v281_v33  ;;  %v312_v61 = vmul.f32 %v914_v54, %v281_v33 }
  0x9e   :  { %v880_v35 = vpop.permute.xlu1 %268 }
  0x9f   :  { %v882_v37 = vpop.permute.xlu0 %288 }
  0xa3   :  { %v892_v42 = vpop.permute.xlu1 %200 }
  0xa4   :  { %v42_v52 = vpop.permute.xlu0 %41 }
  0xa5   :  { %v87_v4 = vmul.f32 %v907_v50, %v42_v52  ;;  %v88_v8 = vmul.f32 %v909_v51, %v42_v52 }
  0xa7   :  { %v175_v12 = vadd.f32 %v159_v7, %v87_v4  ;;  %v176_v17 = vadd.f32 %v160_v10, %v88_v8 }
  0xa8   :  { %v62_v55 = vpop.permute.xlu1 %61  ;;  %v47_v1 = vpop.permute.xlu0 %46 }
  0xa9   :  { %v95_v58 = vmul.f32 %v907_v50, %v62_v55  ;;  %v96_v59 = vmul.f32 %v909_v51, %v62_v55  ;;  %v89_v13 = vmul.f32 %v907_v50, %v47_v1  ;;  %v90_v18 = vmul.f32 %v909_v51, %v47_v1 }
  0xaa   :  { %v247_v34 = vadd.f32 %v231_v11, %v175_v12  ;;  %v248_v22 = vadd.f32 %v232_v16, %v176_v17 }
  0xab   :  { %v183_v62 = vadd.f32 %v167_v48, %v95_v58  ;;  %v184_v63 = vadd.f32 %v168_v49, %v96_v59  ;;  %v177_v26 = vadd.f32 %v161_v15, %v89_v13  ;;  %v178_v40 = vadd.f32 %v162_v19, %v90_v18 }
  0xac   :  { %v922_v0 = vpop.permute.xlu1 %66  ;;  %v57_v14 = vpop.permute.xlu0 %56  ;;  %v237_v48 = vmul.f32 %v900_v46, %v867_v25  ;;  %v319_v52 = vadd.f32 %v303_v21, %v247_v34  ;;  %v320_v58 = vadd.f32 %v304_v23, %v248_v22  ;;  %v310_v25 = vmul.f32 %v914_v54, %v875_v30 }
  0xad   :  { %v255_v2 = vadd.f32 %v239_v56, %v183_v62  ;;  %v256_v3 = vadd.f32 %v240_v57, %v184_v63  ;;  %v93_v20 = vmul.f32 %v907_v50, %v57_v14  ;;  %v94_v43 = vmul.f32 %v909_v51, %v57_v14 }
  0xae   :  { %v249_v55 = vadd.f32 %v233_v36, %v177_v26  ;;  %v166_v56 = vmul.f32 %v897_v45, %v877_v32  ;;  %v305_v57 = vmul.f32 %v912_v53, %v880_v35  ;;  %v306_v62 = vmul.f32 %v914_v54, %v880_v35 }
  0xaf   :  { %v925_v5 = vadd.f32 %v311_v60, %v255_v2  ;;  %v927_v6 = vadd.f32 %v312_v61, %v256_v3  ;;  %v181_v49 = vadd.f32 %v165_v39, %v93_v20  ;;  %v250_v60 = vadd.f32 %v234_v41, %v178_v40 }
  0xb0   :  { %v309_v61 = vmul.f32 %v912_v53, %v875_v30  ;;  %v182_v63 = vadd.f32 %v166_v56, %v94_v43  ;;  %v966_v1 = vpop.permute.xlu0 %76  ;;  %v321_v4 = vadd.f32 %v305_v57, %v249_v55  ;;  %v163_v40 = vmul.f32 %v895_v44, %v873_v29 }
  0xb1   :  { %v931_v9 = vpop.permute.xlu1 %140  ;;  %v253_v32 = vadd.f32 %v237_v48, %v181_v49  ;;  %v322_v8 = vadd.f32 %v306_v62, %v250_v60  ;;  %v164_v22 = vmul.f32 %v897_v45, %v873_v29  ;;  %v97_v41 = vmul.f32 %v907_v50, %v922_v0 }
  0xb2   :  { %v254_v11 = vadd.f32 %v238_v24, %v182_v63  ;;  %v169_v36 = vmul.f32 %v895_v44, %v931_v9  ;;  %v170_v23 = vmul.f32 %v897_v45, %v931_v9  ;;  %v98_v43 = vmul.f32 %v909_v51, %v922_v0 }
  0xb3   :  { %v325_v35 = vadd.f32 %v309_v61, %v253_v32  ;;  %v91_v9 = vmul.f32 %v907_v50, %v869_v27  ;;  %v235_v55 = vmul.f32 %v900_v46, %v892_v42  ;;  %v236_v29 = vmul.f32 %v902_v47, %v892_v42 }
  0xb4   :  { %v353_v15 = vpop.permute.xlu0 %352  ;;  %v326_v17 = vadd.f32 %v310_v25, %v254_v11  ;;  %v185_v56 = vadd.f32 %v169_v36, %v97_v41 }
  0xb5   :  { %v381_v18 = vadd.f32 %v353_v15, %v325_v35  ;;  %v179_v57 = vadd.f32 %v163_v40, %v91_v9 }
  0xb6   :  { %v943_v33 = vpop.permute.xlu1 %272  ;;  %v382_v21 = vadd.f32 %v353_v15, %v326_v17 }
  0xb7   :  { %v986_v26 = vmax.f32 %v381_v18, 0.0  ;;  %v251_v63 = vadd.f32 %v235_v55, %v179_v57  ;;  %v102_v55 = vmul.f32 %v909_v51, %v966_v1 }
  0xb8   :  { %v990_v20 = vmax.f32 %v382_v21, 0.0 }
  0xbb   :  { %v338_v28 = vpop.permute.xlu1 %337 }
  0xbc   :  { %v375_v59 = vadd.f32 %v338_v28, %v319_v52  ;;  %v376_v2 = vadd.f32 %v338_v28, %v320_v58  ;;  %v92_v52 = vmul.f32 %v909_v51, %v869_v27  ;;  %v186_v28 = vadd.f32 %v170_v23, %v98_v43 }
  0xbd   :  { %v307_v58 = vmul.f32 %v912_v53, %v943_v33 }
  0xbe   :  { %v968_v3 = vmax.f32 %v375_v59, 0.0  ;;  %v974_v12 = vmax.f32 %v376_v2, 0.0  ;;  %v180_v0 = vadd.f32 %v164_v22, %v92_v52  ;;  %v308_v59 = vmul.f32 %v914_v54, %v943_v33 }
  0xbf   :  { %v343_v7 = vpop.permute.xlu1 %342  ;;  %v101_v52 = vmul.f32 %v907_v50, %v966_v1  ;;  %v316_v1 = vmul.f32 %v914_v54, %v882_v37 }
  0xc0   :  { %v377_v10 = vadd.f32 %v343_v7, %v321_v4  ;;  %426 = vrot.lane.b32.xlu0 %v968_v3, %s784_s27  ;;  %v378_v13 = vadd.f32 %v343_v7, %v322_v8  ;;  %v252_v32 = vadd.f32 %v236_v29, %v180_v0  ;;  %v363_v4 = vpop.permute.xlu0 %362  ;;  %v323_v7 = vadd.f32 %v307_v58, %v251_v63 }
  0xc2   :  { %v976_v14 = vmax.f32 %v377_v10, 0.0  ;;  %v982_v19 = vmax.f32 %v378_v13, 0.0  ;;  %v324_v8 = vadd.f32 %v308_v59, %v252_v32 }
  0xc4   :  { %v213_v16 = vpop.permute.xlu1 %212  ;;  %428 = vrot.lane.b32.xlu1 %v976_v14, %s784_s27  ;;  %442 = vrot.lane.b32.xlu0 %v974_v12, %s784_s27 }
  0xc5   :  { %v241_v48 = vmul.f32 %v900_v46, %v213_v16  ;;  %v242_v49 = vmul.f32 %v902_v47, %v213_v16 }
  0xc7   :  { %v257_v24 = vadd.f32 %v241_v48, %v185_v56  ;;  %v258_v61 = vadd.f32 %v242_v49, %v186_v28 }
  0xc8   :  { %444 = vrot.lane.b32.xlu1 %v982_v19, %s784_s27 }
  0xc9   :  { %v72_v30 = vpop.permute.xlu1 %71 }
  0xca   :  { %v99_v43 = vmul.f32 %v907_v50, %v72_v30  ;;  %v100_v48 = vmul.f32 %v909_v51, %v72_v30  ;;  %v315_v51 = vmul.f32 %v912_v53, %v882_v37 }
  0xcc   :  { %432 = vrot.lane.b32.xlu1 %v986_v26, %s784_s27 }
  0xce   :  { %v145_v34 = vpop.permute.xlu1 %144 }
  0xcf   :  { %v171_v40 = vmul.f32 %v895_v44, %v145_v34  ;;  %v172_v22 = vmul.f32 %v897_v45, %v145_v34 }
  0xd0   :  { %448 = vrot.lane.b32.xlu1 %v990_v20, %s784_s27 }
  0xd1   :  { %v187_v29 = vadd.f32 %v171_v40, %v99_v43  ;;  %v188_v56 = vadd.f32 %v172_v22, %v100_v48  ;;  %v786_v22 = vmov 1.0  }
  0xd2   :  { %v149_v39 = vpop.permute.xlu1 %148 }
  0xd3   :  { %v173_v28 = vmul.f32 %v895_v44, %v149_v39  ;;  %v174_v34 = vmul.f32 %v897_v45, %v149_v39 }
  0xd5   :  { %v189_v44 = vadd.f32 %v173_v28, %v101_v52 }
  0xd7   :  { %v285_v60 = vpop.permute.xlu1 %284 }
  0xd8   :  { %v313_v27 = vmul.f32 %v912_v53, %v285_v60  ;;  %v314_v62 = vmul.f32 %v914_v54, %v285_v60 }
  0xda   :  { %v329_v42 = vadd.f32 %v313_v27, %v257_v24  ;;  %v330_v2 = vadd.f32 %v314_v62, %v258_v61  ;;  %v190_v24 = vadd.f32 %v174_v34, %v102_v55 }
  0xdc   :  { %v348_v10 = vpop.permute.xlu1 %347  ;;  %v385_v25 = vadd.f32 %v363_v4, %v329_v42  ;;  %v386_v33 = vadd.f32 %v363_v4, %v330_v2 }
  0xdd   :  { %v379_v11 = vadd.f32 %v348_v10, %v323_v7  ;;  %v380_v35 = vadd.f32 %v348_v10, %v324_v8 }
  0xde   :  { %v1022_v13 = vmax.f32 %v385_v25, 0.0  ;;  %v1040_v36 = vmax.f32 %v386_v33, 0.0 }
  0xdf   :  { %v1024_v15 = vmax.f32 %v379_v11, 0.0  ;;  %v1026_v16 = vmax.f32 %v380_v35, 0.0 }
  0xe0   :  { %436 = vrot.lane.b32.xlu1 %v1022_v13, %s784_s27 }
  0xe1   :  { %v217_v17 = vpop.permute.xlu1 %216  ;;  %430 = vrot.lane.b32.xlu0 %v1024_v15, %s784_s27  ;;  %v1034_v18 = vpack.c.bf16 %v990_v20, %v1026_v16  ;;  %v1038_v21 = vpack.c.bf16 %v986_v26, %v1024_v15 }
  0xe2   :  { %v243_v49 = vmul.f32 %v900_v46, %v217_v17  ;;  %v244_v9 = vmul.f32 %v902_v47, %v217_v17  ;;  %v557_v17 = vld [vmem:[%s1263_s3 + $0x8] sm:$0xff] }
  0xe3   :  { %673 = vmatprep.mubr.msk.f32.mxu0 %vm572_vm0, %v557_v17 }
  0xe4   :  { %452 = vrot.lane.b32.xlu1 %v1040_v36, %s784_s27  ;;  %v259_v57 = vadd.f32 %v243_v49, %v187_v29  ;;  %v260_v0 = vadd.f32 %v244_v9, %v188_v56 }
  0xe5   :  { %v221_v23 = vpop.permute.xlu1 %220  ;;  %446 = vrot.lane.b32.xlu0 %v1026_v16, %s784_s27 }
  0xe6   :  { %v245_v30 = vmul.f32 %v900_v46, %v221_v23  ;;  %v246_v59 = vmul.f32 %v902_v47, %v221_v23  ;;  %v331_v47 = vadd.f32 %v315_v51, %v259_v57  ;;  %v332_v62 = vadd.f32 %v316_v1, %v260_v0 }
  0xe8   :  { %v262_v63 = vadd.f32 %v246_v59, %v190_v24 }
  0xea   :  { %v293_v41 = vpop.permute.xlu1 %292 }
  0xeb   :  { %v317_v45 = vmul.f32 %v912_v53, %v293_v41  ;;  %v318_v39 = vmul.f32 %v914_v54, %v293_v41 }
  0xed   :  { %v334_v2 = vadd.f32 %v318_v39, %v262_v63 }
  0xef   :  { %v358_v58 = vpop.permute.xlu1 %357 }
  0xf0   :  { %v383_v60 = vadd.f32 %v358_v58, %v925_v5  ;;  %v384_v50 = vadd.f32 %v358_v58, %v927_v6  ;;  %v261_v5 = vadd.f32 %v245_v30, %v189_v44 }
  0xf2   :  { %v399_v61 = vmax.f32 %v383_v60, 0.0  ;;  %v400_v46 = vmax.f32 %v384_v50, 0.0  ;;  %v333_v53 = vadd.f32 %v317_v45, %v261_v5 }
  0xf3   :  { %v368_v27 = vpop.permute.xlu1 %367 }
  0xf4   :  { %434 = vrot.lane.b32.xlu0 %v399_v61, %s784_s27  ;;  %v1070_v6 = vpack.c.bf16 %v1040_v36, %v400_v46  ;;  %v1073_v37 = vpack.c.bf16 %v1022_v13, %v399_v61  ;;  %v387_v32 = vadd.f32 %v368_v27, %v331_v47  ;;  %v388_v42 = vadd.f32 %v368_v27, %v332_v62 }
  0xf6   :  { %v403_v8 = vmax.f32 %v387_v32, 0.0  ;;  %v404_v10 = vmax.f32 %v388_v42, 0.0 }
  0xf7   :  { %v373_v54 = vpop.permute.xlu1 %372 }
  0xf8   :  { %v389_v4 = vadd.f32 %v373_v54, %v333_v53  ;;  %v390_v7 = vadd.f32 %v373_v54, %v334_v2  ;;  %450 = vrot.lane.b32.xlu0 %v400_v46, %s784_s27 }
  0xfa   :  { %v405_v25 = vmax.f32 %v389_v4, 0.0  ;;  %v406_v11 = vmax.f32 %v390_v7, 0.0 }
  0xfc   :  { %440 = vrot.lane.b32.xlu1 %v405_v25, %s784_s27  ;;  %438 = vrot.lane.b32.xlu0 %v403_v8, %s784_s27  ;;  %v1078_v35 = vpack.c.bf16 %v406_v11, %v404_v10  ;;  %v1080_v33 = vpack.c.bf16 %v405_v25, %v403_v8 }
 0x100   :  { %456 = vrot.lane.b32.xlu1 %v406_v11, %s784_s27  ;;  %454 = vrot.lane.b32.xlu0 %v404_v10, %s784_s27 }
 0x104   :  { %493 = vrot.lane.b32.xlu1 %v976_v14, %s785_s28  ;;  %491 = vrot.lane.b32.xlu0 %v968_v3, %s785_s28 }
 0x108   :  { %509 = vrot.lane.b32.xlu1 %v982_v19, %s785_s28  ;;  %507 = vrot.lane.b32.xlu0 %v974_v12, %s785_s28 }
 0x10c   :  { %497 = vrot.lane.b32.xlu1 %v986_v26, %s785_s28  ;;  %495 = vrot.lane.b32.xlu0 %v1024_v15, %s785_s28  ;;  %v559_v26 = vld [vmem:[%s1263_s3 + $0x18] sm:$0xff]  ;;  %v1111_v15 = vand.u32 127, %v79_v31 }
 0x10d   :  { %674 = vmatprep.mubr.msk.f32.mxu1 %vm572_vm0, %v559_v26 }
 0x10e   :  { %vm410_vm1 = vcmp.eq.s32.totalorder %v1111_v15, 0  ;;  %vm458_vm3 = vcmp.lt.s32.totalorder %v1111_v15, 1  ;;  %vm523_vm4 = vcmp.lt.s32.totalorder %v1111_v15, 127  ;;  %vm412_vm6 = vcmp.eq.s32.totalorder %v1111_v15, 127 }
 0x10f   :  { %v1120_v41 = vsel %vm410_vm1, 0.0, %v786_v22 }
 0x110   :  { %513 = vrot.lane.b32.xlu1 %v990_v20, %s785_s28  ;;  %511 = vrot.lane.b32.xlu0 %v1026_v16, %s785_s28  ;;  %v561_v20 = vld [vmem:[%s1264_s4 + $0x8] sm:$0xff] }
 0x114   :  { %501 = vrot.lane.b32.xlu1 %v1022_v13, %s785_s28  ;;  %499 = vrot.lane.b32.xlu0 %v399_v61, %s785_s28  ;;  %v560_v13 = vld [vmem:[%s1264_s4] sm:$0xff] }
 0x118   :  { %517 = vrot.lane.b32.xlu1 %v1040_v36, %s785_s28  ;;  %515 = vrot.lane.b32.xlu0 %v400_v46, %s785_s28  ;;  %v1114_v36 = vadd.s32 128, %v1111_v15  ;;  %v558_v15 = vld [vmem:[%s1263_s3 + $0x10] sm:$0xff] }
 0x11a   :  { %vm415_vm2 = vcmp.eq.s32.totalorder %v1114_v36, 128  ;;  %vm419_vm5 = vcmp.eq.s32.totalorder %v1114_v36, 255 }
 0x11b   :  { %v1123_v38 = vsel %vm415_vm2, 0.0, %v786_v22 }
 0x11c   :  { %505 = vrot.lane.b32.xlu1 %v405_v25, %s785_s28  ;;  %503 = vrot.lane.b32.xlu0 %v403_v8, %s785_s28 }
 0x120   :  { %521 = vrot.lane.b32.xlu1 %v406_v11, %s785_s28  ;;  %519 = vrot.lane.b32.xlu0 %v404_v10, %s785_s28 }
 0x124   :  { %569 = vperm.xlu1 %779, %v561_v20   ;;  %564 = vperm.xlu0 %777, %v560_v13  }
 0x132   :  { %v427_v16 = vpop.permute.xlu0 %426 }
 0x136   :  { %v429_v23 = vpop.permute.xlu1 %428  ;;  %v443_v40 = vpop.permute.xlu0 %442 }
 0x137   :  { %v459_v31 = vsel %vm458_vm3, %v427_v16, %v443_v40  ;;  %v467_v43 = vsel %vm458_vm3, %v443_v40, %v427_v16 }
 0x138   :  { %v475_v52 = vmul.f32 %v467_v43, %v1120_v41  ;;  %v476_v55 = vmul.f32 %v459_v31, %v1123_v38 }
 0x13a   :  { %v445_v48 = vpop.permute.xlu1 %444 }
 0x13b   :  { %v460_v49 = vsel %vm458_vm3, %v429_v23, %v445_v48  ;;  %v468_v9 = vsel %vm458_vm3, %v445_v48, %v429_v23 }
 0x13c   :  { %v477_v29 = vmul.f32 %v468_v9, %v1120_v41  ;;  %v478_v56 = vmul.f32 %v460_v49, %v1123_v38 }
 0x13e   :  { %v679_v28 = vpack.c.bf16 %v478_v56, %v476_v55  ;;  %v681_v34 = vpack.c.bf16 %v477_v29, %v475_v52  ;;  %v433_v57 = vpop.permute.xlu1 %432  ;;  %v695_v55 = vpack.c.bf16 %v982_v19, %v974_v12  ;;  %v1183_v12 = vsel %vm419_vm5, 0.0, %v786_v22 }
 0x140   :  { %680 = vmatprep.subr.bf16.mxu0 %v679_v28  ;;  %727 = vmatprep.subr.bf16.mxu1 %v679_v28 }
 0x141   :  { %682 = vmatpush1.bf16.msra.mxu0 %v681_v34  ;;  %739 = vmatpush1.bf16.msra.mxu1 %v681_v34 }
 0x142   :  { %v449_v0 = vpop.permute.xlu1 %448 }
 0x143   :  { %v462_v30 = vsel %vm458_vm3, %v433_v57, %v449_v0  ;;  %v470_v59 = vsel %vm458_vm3, %v449_v0, %v433_v57 }
 0x144   :  { %v481_v1 = vmul.f32 %v470_v59, %v1120_v41  ;;  %v482_v44 = vmul.f32 %v462_v30, %v1123_v38 }
 0x152   :  { %v437_v46 = vpop.permute.xlu1 %436 }
 0x153   :  { %v431_v58 = vpop.permute.xlu0 %430 }
 0x156   :  { %v453_v27 = vpop.permute.xlu1 %452 }
 0x157   :  { %v447_v60 = vpop.permute.xlu0 %446  ;;  %v464_v62 = vsel %vm458_vm3, %v437_v46, %v453_v27  ;;  %v472_v5 = vsel %vm458_vm3, %v453_v27, %v437_v46 }
 0x158   :  { %v461_v50 = vsel %vm458_vm3, %v431_v58, %v447_v60  ;;  %v469_v51 = vsel %vm458_vm3, %v447_v60, %v431_v58  ;;  %v485_v53 = vmul.f32 %v472_v5, %v1120_v41  ;;  %v486_v2 = vmul.f32 %v464_v62, %v1123_v38 }
 0x159   :  { %v479_v24 = vmul.f32 %v469_v51, %v1120_v41  ;;  %v480_v45 = vmul.f32 %v461_v50, %v1123_v38 }
 0x15b   :  { %v683_v39 = vpack.c.bf16 %v482_v44, %v480_v45  ;;  %v685_v61 = vpack.c.bf16 %v481_v1, %v479_v24 }
 0x15d   :  { %684 = vmatprep.subr.bf16.mxu0 %v683_v39  ;;  %728 = vmatprep.subr.bf16.mxu1 %v683_v39 }
 0x15e   :  { %686 = vmatpush1.bf16.msra.mxu0 %v685_v61  ;;  %740 = vmatpush1.bf16.msra.mxu1 %v685_v61 }
 0x166   :  { %v435_v47 = vpop.permute.xlu0 %434 }
 0x16a   :  { %v451_v63 = vpop.permute.xlu0 %450 }
 0x16b   :  { %v463_v32 = vsel %vm458_vm3, %v435_v47, %v451_v63  ;;  %v471_v42 = vsel %vm458_vm3, %v451_v63, %v435_v47 }
 0x16c   :  { %v483_v54 = vmul.f32 %v471_v42, %v1120_v41  ;;  %v484_v4 = vmul.f32 %v463_v32, %v1123_v38 }
 0x16e   :  { %v441_v7 = vpop.permute.xlu1 %440  ;;  %v439_v8 = vpop.permute.xlu0 %438  ;;  %v687_v10 = vpack.c.bf16 %v486_v2, %v484_v4  ;;  %v689_v25 = vpack.c.bf16 %v485_v53, %v483_v54 }
 0x170   :  { %688 = vmatprep.subr.bf16.mxu0 %v687_v10  ;;  %729 = vmatprep.subr.bf16.mxu1 %v687_v10 }
 0x171   :  { %690 = vmatpush1.bf16.msra.mxu0 %v689_v25  ;;  %741 = vmatpush1.bf16.msra.mxu1 %v689_v25 }
 0x172   :  { %v457_v11 = vpop.permute.xlu1 %456  ;;  %v455_v17 = vpop.permute.xlu0 %454 }
 0x173   :  { %v466_v26 = vsel %vm458_vm3, %v441_v7, %v457_v11  ;;  %v474_v20 = vsel %vm458_vm3, %v457_v11, %v441_v7  ;;  %v465_v13 = vsel %vm458_vm3, %v439_v8, %v455_v17  ;;  %v473_v16 = vsel %vm458_vm3, %v455_v17, %v439_v8 }
 0x174   :  { %v489_v23 = vmul.f32 %v474_v20, %v1120_v41  ;;  %v490_v40 = vmul.f32 %v466_v26, %v1123_v38  ;;  %v487_v31 = vmul.f32 %v473_v16, %v1120_v41  ;;  %v488_v43 = vmul.f32 %v465_v13, %v1123_v38 }
 0x175   :  { %v697_v41 = vpack.c.bf16 %v976_v14, %v968_v3 }
 0x176   :  { %v494_v48 = vpop.permute.xlu1 %493  ;;  %v492_v49 = vpop.permute.xlu0 %491  ;;  %v691_v9 = vpack.c.bf16 %v490_v40, %v488_v43  ;;  %v693_v52 = vpack.c.bf16 %v489_v23, %v487_v31  ;;  %v556_v43 = vld [vmem:[%s1263_s3] sm:$0xff] }
 0x178   :  { %692 = vmatprep.subr.bf16.mxu0 %v691_v9  ;;  %730 = vmatprep.subr.bf16.mxu1 %v691_v9 }
 0x179   :  { %694 = vmatpush1.bf16.msra.mxu0 %v693_v52  ;;  %742 = vmatpush1.bf16.msra.mxu1 %v693_v52 }
 0x17a   :  { %v510_v29 = vpop.permute.xlu1 %509  ;;  %696 = vmatprep.subr.bf16.mxu0 %v695_v55  ;;  %731 = vmatprep.subr.bf16.mxu1 %v695_v55  ;;  %v508_v56 = vpop.permute.xlu0 %507 }
 0x17b   :  { %v533_v3 = vsel %vm523_vm4, %v510_v29, %v494_v48  ;;  %v532_v14 = vsel %vm523_vm4, %v508_v56, %v492_v49  ;;  %v525_v34 = vsel %vm523_vm4, %v494_v48, %v510_v29  ;;  %v524_v57 = vsel %vm523_vm4, %v492_v49, %v508_v56  ;;  %v675_v48 = vld [vmem:[%s1262_s0 + $0x4] sm:$0xf] }
 0x17c   :  { %v543_v0 = vmul.f32 %v533_v3, %v1183_v12  ;;  %v541_v58 = vmul.f32 %v532_v14, %v1183_v12  ;;  %676 = vst [vmem:[%s1265_s5 + $0x18] sm:$0xf] %v675_v48 }
 0x17d   :  { %698 = vmatpush1.bf16.msra.mxu0 %v697_v41  ;;  %743 = vmatpush1.bf16.msra.mxu1 %v697_v41 }
 0x17e   :  { %v498_v38 = vpop.permute.xlu1 %497  ;;  %v496_v28 = vpop.permute.xlu0 %495  ;;  %700 = vmatprep.subr.bf16.mxu0 %v1034_v18  ;;  %732 = vmatprep.subr.bf16.mxu1 %v1034_v18  ;;  %v424_v18 = vsel %vm412_vm6, 0.0, %v786_v22  ;;  %v711_v24 = vpack.c.bf16 %v543_v0, %v541_v58 }
 0x17f   :  { %v540_v22 = vmul.f32 %v524_v57, %v424_v18 }
 0x181   :  { %702 = vmatpush1.bf16.msra.mxu0 %v1038_v21  ;;  %744 = vmatpush1.bf16.msra.mxu1 %v1038_v21 }
 0x182   :  { %v514_v19 = vpop.permute.xlu1 %513  ;;  %v512_v36 = vpop.permute.xlu0 %511  ;;  %704 = vmatprep.subr.bf16.mxu0 %v1070_v6  ;;  %733 = vmatprep.subr.bf16.mxu1 %v1070_v6  ;;  %v542_v6 = vmul.f32 %v525_v34, %v424_v18 }
 0x183   :  { %v535_v21 = vsel %vm523_vm4, %v514_v19, %v498_v38  ;;  %v534_v30 = vsel %vm523_vm4, %v512_v36, %v496_v28  ;;  %v527_v50 = vsel %vm523_vm4, %v498_v38, %v514_v19  ;;  %v526_v51 = vsel %vm523_vm4, %v496_v28, %v512_v36 }
 0x184   :  { %v547_v1 = vmul.f32 %v535_v21, %v1183_v12  ;;  %v545_v44 = vmul.f32 %v534_v30, %v1183_v12  ;;  %v544_v45 = vmul.f32 %v526_v51, %v424_v18 }
 0x185   :  { %706 = vmatpush1.bf16.msra.mxu0 %v1073_v37  ;;  %745 = vmatpush1.bf16.msra.mxu1 %v1073_v37  ;;  %v546_v37 = vmul.f32 %v527_v50, %v424_v18 }
 0x186   :  { %v502_v59 = vpop.permute.xlu1 %501  ;;  %v500_v60 = vpop.permute.xlu0 %499  ;;  %708 = vmatprep.subr.bf16.mxu0 %v1078_v35  ;;  %734 = vmatprep.subr.bf16.mxu1 %v1078_v35  ;;  %v713_v35 = vpack.c.bf16 %v542_v6, %v540_v22  ;;  %v715_v63 = vpack.c.bf16 %v547_v1, %v545_v44 }
 0x187   :  { %v717_v54 = vpack.c.bf16 %v546_v37, %v544_v45 }
 0x189   :  { %710 = vmatpush1.bf16.msra.mxu0 %v1080_v33  ;;  %746 = vmatpush1.bf16.msra.mxu1 %v1080_v33 }
 0x18a   :  { %v518_v39 = vpop.permute.xlu1 %517  ;;  %v516_v61 = vpop.permute.xlu0 %515  ;;  %712 = vmatprep.subr.bf16.mxu0 %v711_v24  ;;  %735 = vmatprep.subr.bf16.mxu1 %v711_v24 }
 0x18b   :  { %v529_v46 = vsel %vm523_vm4, %v502_v59, %v518_v39  ;;  %v537_v27 = vsel %vm523_vm4, %v518_v39, %v502_v59  ;;  %v528_v47 = vsel %vm523_vm4, %v500_v60, %v516_v61  ;;  %v536_v62 = vsel %vm523_vm4, %v516_v61, %v500_v60 }
 0x18c   :  { %v551_v33 = vmul.f32 %v537_v27, %v1183_v12  ;;  %v549_v5 = vmul.f32 %v536_v62, %v1183_v12  ;;  %v550_v32 = vmul.f32 %v529_v46, %v424_v18  ;;  %v548_v42 = vmul.f32 %v528_v47, %v424_v18 }
 0x18d   :  { %714 = vmatpush1.bf16.msra.mxu0 %v713_v35  ;;  %747 = vmatpush1.bf16.msra.mxu1 %v713_v35 }
 0x18e   :  { %v506_v53 = vpop.permute.xlu1 %505  ;;  %v504_v2 = vpop.permute.xlu0 %503  ;;  %716 = vmatprep.subr.bf16.mxu0 %v715_v63  ;;  %736 = vmatprep.subr.bf16.mxu1 %v715_v63  ;;  %v719_v4 = vpack.c.bf16 %v551_v33, %v549_v5  ;;  %v721_v10 = vpack.c.bf16 %v550_v32, %v548_v42 }
 0x191   :  { %718 = vmatpush1.bf16.msra.mxu0 %v717_v54  ;;  %748 = vmatpush1.bf16.msra.mxu1 %v717_v54 }
 0x192   :  { %v522_v7 = vpop.permute.xlu1 %521  ;;  %v520_v8 = vpop.permute.xlu0 %519  ;;  %720 = vmatprep.subr.bf16.mxu0 %v719_v4  ;;  %737 = vmatprep.subr.bf16.mxu1 %v719_v4 }
 0x193   :  { %v531_v25 = vsel %vm523_vm4, %v506_v53, %v522_v7  ;;  %v539_v11 = vsel %vm523_vm4, %v522_v7, %v506_v53  ;;  %v530_v17 = vsel %vm523_vm4, %v504_v2, %v520_v8  ;;  %v538_v26 = vsel %vm523_vm4, %v520_v8, %v504_v2 }
 0x194   :  { %v554_v20 = vmul.f32 %v531_v25, %v424_v18  ;;  %v555_v13 = vmul.f32 %v539_v11, %v1183_v12  ;;  %v552_v16 = vmul.f32 %v530_v17, %v424_v18  ;;  %v553_v23 = vmul.f32 %v538_v26, %v1183_v12 }
 0x195   :  { %722 = vmatpush1.bf16.msra.mxu0 %v721_v10  ;;  %749 = vmatpush1.bf16.msra.mxu1 %v721_v10 }
 0x196   :  { %v723_v40 = vpack.c.bf16 %v555_v13, %v553_v23  ;;  %v725_v31 = vpack.c.bf16 %v554_v20, %v552_v16 }
 0x198   :  { %724 = vmatprep.subr.bf16.mxu0 %v723_v40  ;;  %738 = vmatprep.subr.bf16.mxu1 %v723_v40 }
 0x199   :  { %726 = vmatpush1.bf16.msra.mxu0 %v725_v31  ;;  %750 = vmatpush1.bf16.msra.mxu1 %v725_v31 }
 0x19c   :  { %644 = vmatmul.mubr.f32.vlgmr.msra.gmra.mrb[0].mxu0 %v556_v43  ;;  %650 = vmatmul.mubr.f32.vlgmr.msra.gmra.mrb[0].mxu1 %v558_v15 }
 0x1a3   :  { %v570_v49 = vpop.permute.xlu1 %569  ;;  %v565_v9 = vpop.permute.xlu0 %564 }
 0x26f   :  { %v645_v52 = vpop.f32.mrb[0].mxu0  ;;  %v651_v55 = vpop.f32.mrb[0].mxu1 }
 0x270   :  { %v646_v29 = vadd.f32 %v645_v52, %v565_v9  ;;  %v652_v56 = vadd.f32 %v651_v55, %v570_v49  ;;  %v647_v41 = vpop.f32.mrb[1].mxu0  ;;  %v653_v38 = vpop.f32.mrb[1].mxu1 }
 0x271   :  { %v648_v28 = vadd.f32 %v647_v41, %v565_v9  ;;  %v654_v12 = vadd.f32 %v653_v38, %v570_v49 }
 0x272   :  { %v656_v3 = vmax.f32 %v646_v29, 0.0  ;;  %v658_v14 = vmax.f32 %v652_v56, 0.0 }
 0x273   :  { %v657_v19 = vmax.f32 %v648_v28, 0.0  ;;  %v659_v36 = vmax.f32 %v654_v12, 0.0 }
 0x274   :  { %661 = vst [vmem:[%s1265_s5 + $0x4] sm:$0xff] %v656_v3  ;;  %662 = vst [vmem:[%s1265_s5 + $0xc] sm:$0xff] %v658_v14 }
 0x275   :  { %677 = vst [vmem:[%s1265_s5 + $0x1c] sm:$0xff] %v657_v19  ;;  %678 = vst [vmem:[%s1265_s5 + $0x24] sm:$0xff] %v659_v36 }

</bundles_post_ra>
